<compile_context>
chip_gen: v7x
topology: tpu7x:2x2x1
jax: 0.10.0
libtpu: 0.0.40
codegen_flags: <defaults>
</compile_context>

<pallas_src>
import functools

import jax
import jax.numpy as jnp
from jax.experimental import pallas as pl
from jax.experimental.pallas import tpu as pltpu


def _round_up(x, m):
    return ((x + m - 1) // m) * m


def attn_general_kernel(hidden_ref, w_ref, b_ref, enc_ref, out_ref,
                        hw_ref, hb_ref, *, s_actual, s_padded, tile_s):
    """Grid axis 0 iterates over tiles of the (padded) sequence.

    hidden_ref: (1, H)       resident
    w_ref:      (H, 2H)      resident (PyTorch Linear weight layout)
    b_ref:      (1, H)       resident
    enc_ref:    (tile_s, 2H) streamed tile of encoder outputs
    out_ref:    (num_tiles, 1, tile_s) f32, resident across the whole grid
    hw_ref:     (1, 2H) scratch  = hidden @ W
    hb_ref:     (1, 1)  scratch  = hidden . b   (constant shift of all scores)
    """
    i = pl.program_id(0)
    num_tiles = pl.num_programs(0)

    @pl.when(i == 0)
    def _init():
        # hW = hidden @ W : (1, H) x (H, 2H) -> (1, 2H), f32 accumulation.
        hw = jnp.dot(hidden_ref[...], w_ref[...],
                     preferred_element_type=jnp.float32)
        hw_ref[...] = hw.astype(hw_ref.dtype)
        # hb = hidden . b  (scalar) -- kept for exact score parity; it is a
        # constant shift so it cancels under softmax anyway.
        hb_ref[...] = jnp.sum(
            hidden_ref[...].astype(jnp.float32) * b_ref[...].astype(jnp.float32),
            axis=-1, keepdims=True)

    # score tile: contract the shared 2H (last) axis of hW and enc -> (1, tile_s)
    scores = jax.lax.dot_general(
        hw_ref[...], enc_ref[...],
        dimension_numbers=(((1,), (1,)), ((), ())),
        preferred_element_type=jnp.float32) + hb_ref[...]

    # Store this tile's raw scores into the VMEM-resident output block.
    out_ref[i] = scores

    @pl.when(i == num_tiles - 1)
    def _finalize():
        s = out_ref[...]                                  # (num_tiles, 1, tile_s)
        if s_actual != s_padded:
            t_idx = jax.lax.broadcasted_iota(jnp.int32, s.shape, 0)
            l_idx = jax.lax.broadcasted_iota(jnp.int32, s.shape, 2)
            pos = t_idx * tile_s + l_idx
            s = jnp.where(pos < s_actual, s, -jnp.inf)
        m = jnp.max(s, axis=(0, 2), keepdims=True)
        e = jnp.exp(s - m)
        denom = jnp.sum(e, axis=(0, 2), keepdims=True)
        out_ref[...] = e * pl.reciprocal(denom, approx=False)


def attn_forward(hidden, encoder_outputs, W, b, *, tile_s=512):
    """hidden: (1, H); encoder_outputs: (S, 1, 2H); W: (H, 2H); b: (H,)
    Returns softmax attention weights of shape (1, 1, S)."""
    S = encoder_outputs.shape[0]
    H = hidden.shape[-1]

    enc2d = encoder_outputs.reshape(S, 2 * H)      # no dtype up-cast
    hidden2d = hidden.reshape(1, H)
    b2d = b.reshape(1, H)

    # Tile size: multiple of 8 (sublane), default 512 (lane-dense multiple of 128).
    if S <= tile_s:
        tile = _round_up(S, 8)
    else:
        tile = tile_s
    s_pad = _round_up(S, tile)
    if s_pad != S:
        enc2d = jnp.pad(enc2d, ((0, s_pad - S), (0, 0)))
    num_tiles = s_pad // tile

    kernel = functools.partial(
        attn_general_kernel, s_actual=S, s_padded=s_pad, tile_s=tile)

    out = pl.pallas_call(
        kernel,
        out_shape=jax.ShapeDtypeStruct((num_tiles, 1, tile), jnp.float32),
        grid_spec=pltpu.PrefetchScalarGridSpec(
            num_scalar_prefetch=0,
            grid=(num_tiles,),
            in_specs=[
                pl.BlockSpec((1, H), lambda i: (0, 0)),          # hidden (resident)
                pl.BlockSpec((H, 2 * H), lambda i: (0, 0)),      # W      (resident)
                pl.BlockSpec((1, H), lambda i: (0, 0)),          # b      (resident)
                pl.BlockSpec((tile, 2 * H), lambda i: (i, 0)),   # enc tile (streamed)
            ],
            out_specs=pl.BlockSpec((num_tiles, 1, tile), lambda i: (0, 0, 0)),
            scratch_shapes=[
                pltpu.VMEM((1, 2 * H), enc2d.dtype),   # hW
                pltpu.VMEM((1, 1), jnp.float32),       # hidden . b
            ],
        ),
        compiler_params=pltpu.CompilerParams(
            dimension_semantics=("arbitrary",),
        ),
    )(hidden2d, W, b2d, enc2d)

    return out.reshape(1, 1, s_pad)[..., :S]


def attn_forward_ref(hidden, encoder_outputs, W, b):
    """Pure-JAX reference matching the PyTorch per-step loop."""
    S = encoder_outputs.shape[0]
    H = hidden.shape[-1]
    enc2d = encoder_outputs.reshape(S, 2 * H)
    energies = enc2d @ W.T + b                      # (S, H)
    scores = energies @ hidden.reshape(H)           # (S,)
    return jax.nn.softmax(scores, axis=-1).reshape(1, 1, S)


if __name__ == "__main__":
    H = 32        # hidden_size
    S = 8         # seq_len

    key = jax.random.PRNGKey(0)
    k_h, k_e, k_w, k_b = jax.random.split(key, 4)

    # Parameters of nn.Linear(2H, H): weight (H, 2H), bias (H,)
    W = jax.random.normal(k_w, (H, 2 * H), dtype=jnp.float32) * 0.1
    b = jax.random.normal(k_b, (H,), dtype=jnp.float32) * 0.1

    hidden = jax.random.normal(k_h, (1, H), dtype=jnp.float32)
    encoder_outputs = jax.random.normal(k_e, (S, 1, 2 * H), dtype=jnp.float32)

    out = attn_forward(hidden, encoder_outputs, W, b)
    out = jax.block_until_ready(out)
    ref = attn_forward_ref(hidden, encoder_outputs, W, b)
    assert out.shape == (1, 1, S), out.shape
    assert jnp.allclose(out, ref, atol=1e-5, rtol=1e-5), (out, ref)

    # Also exercise the multi-tile + padded/masked path.
    S2 = 300
    enc2 = jax.random.normal(jax.random.PRNGKey(1), (S2, 1, 2 * H), dtype=jnp.float32)
    out2 = jax.block_until_ready(attn_forward(hidden, enc2, W, b, tile_s=128))
    ref2 = attn_forward_ref(hidden, enc2, W, b)
    assert out2.shape == (1, 1, S2), out2.shape
    assert jnp.allclose(out2, ref2, atol=1e-5, rtol=1e-5)

    print("KERNEL_OK")
</pallas_src>

<mosaic_0001>
module attributes {stable_mosaic.version = 11 : i64} {
  func.func @attn_general_kernel(%arg0: i32, %arg1: memref<1x32xf32, #tpu.memory_space<vmem>>, %arg2: memref<32x64xf32, #tpu.memory_space<vmem>>, %arg3: memref<1x32xf32, #tpu.memory_space<vmem>>, %arg4: memref<8x64xf32, #tpu.memory_space<vmem>>, %arg5: memref<1x1x8xf32, #tpu.memory_space<vmem>>, %arg6: memref<1x64xf32, #tpu.memory_space<vmem>>, %arg7: memref<1x1xf32, #tpu.memory_space<vmem>>) attributes {dimension_semantics = [#tpu.dimension_semantics<arbitrary>], iteration_bounds = array<i64: 1>, scalar_prefetch = 0 : i64, scratch_operands = 2 : i64, tpu.core_type = #tpu.core_type<tc>, window_params = [{pipeline_mode = #tpu.pipeline_mode<synchronous>, transform_indices = @transform_0, window_bounds = array<i64: 1, 32>}, {pipeline_mode = #tpu.pipeline_mode<synchronous>, transform_indices = @transform_1, window_bounds = array<i64: 32, 64>}, {pipeline_mode = #tpu.pipeline_mode<synchronous>, transform_indices = @transform_2, window_bounds = array<i64: 1, 32>}, {transform_indices = @transform_3, window_bounds = array<i64: 8, 64>}, {pipeline_mode = #tpu.pipeline_mode<synchronous>, transform_indices = @transform_4, window_bounds = array<i64: 1, 1, 8>}]} {
    %c0_i32 = arith.constant 0 : i32
    %0 = arith.cmpi eq, %arg0, %c0_i32 : i32
    %1 = arith.extui %0 : i1 to i32
    %c0_i32_0 = arith.constant 0 : i32
    %2 = arith.cmpi ne, %1, %c0_i32_0 : i32
    scf.if %2 {
      %c0_10 = arith.constant 0 : index
      %c0_11 = arith.constant 0 : index
      %16 = vector.load %arg1[%c0_10, %c0_11] : memref<1x32xf32, #tpu.memory_space<vmem>>, vector<1x32xf32>
      %c0_12 = arith.constant 0 : index
      %c0_13 = arith.constant 0 : index
      %17 = vector.load %arg2[%c0_12, %c0_13] : memref<32x64xf32, #tpu.memory_space<vmem>>, vector<32x64xf32>
      %cst_14 = arith.constant dense<0.000000e+00> : vector<1x64xf32>
      %18 = tpu.matmul %16, %17, %cst_14 {dimension_numbers = #tpu.dot_dimension_numbers<[1], [0], [0], [1], [0, 0, 1, 1], [], []>} : vector<1x32xf32>, vector<32x64xf32>, vector<1x64xf32> -> vector<1x64xf32>
      %c0_15 = arith.constant 0 : index
      %c0_16 = arith.constant 0 : index
      %19 = vector.load %arg6[%c0_15, %c0_16] : memref<1x64xf32, #tpu.memory_space<vmem>>, vector<1x64xf32>
      tpu.vector_store %arg6[%c0_15, %c0_16], %18 {strides = array<i32>} : memref<1x64xf32, #tpu.memory_space<vmem>>, vector<1x64xf32>,
      %c0_17 = arith.constant 0 : index
      %c0_18 = arith.constant 0 : index
      %20 = vector.load %arg1[%c0_17, %c0_18] : memref<1x32xf32, #tpu.memory_space<vmem>>, vector<1x32xf32>
      %c0_19 = arith.constant 0 : index
      %c0_20 = arith.constant 0 : index
      %21 = vector.load %arg3[%c0_19, %c0_20] : memref<1x32xf32, #tpu.memory_space<vmem>>, vector<1x32xf32>
      %22 = arith.mulf %20, %21 : vector<1x32xf32>
      %cst_21 = arith.constant dense<0.000000e+00> : vector<1xf32>
      %23 = vector.multi_reduction <add>, %22, %cst_21 [1] : vector<1x32xf32> to vector<1xf32>
      %24 = vector.shape_cast %23 : vector<1xf32> to vector<1x1xf32>
      %c0_22 = arith.constant 0 : index
      %c0_23 = arith.constant 0 : index
      %25 = vector.load %arg7[%c0_22, %c0_23] : memref<1x1xf32, #tpu.memory_space<vmem>>, vector<1x1xf32>
      tpu.vector_store %arg7[%c0_22, %c0_23], %24 {strides = array<i32>} : memref<1x1xf32, #tpu.memory_space<vmem>>, vector<1x1xf32>,
    } else {
    }
    %c0 = arith.constant 0 : index
    %c0_1 = arith.constant 0 : index
    %3 = vector.load %arg6[%c0, %c0_1] : memref<1x64xf32, #tpu.memory_space<vmem>>, vector<1x64xf32>
    %c0_2 = arith.constant 0 : index
    %c0_3 = arith.constant 0 : index
    %4 = vector.load %arg4[%c0_2, %c0_3] : memref<8x64xf32, #tpu.memory_space<vmem>>, vector<8x64xf32>
    %cst = arith.constant dense<0.000000e+00> : vector<1x8xf32>
    %5 = tpu.matmul %3, %4, %cst {dimension_numbers = #tpu.dot_dimension_numbers<[1], [1], [0], [0], [0, 0, 1, 0], [], []>} : vector<1x64xf32>, vector<8x64xf32>, vector<1x8xf32> -> vector<1x8xf32>
    %c0_4 = arith.constant 0 : index
    %c0_5 = arith.constant 0 : index
    %6 = vector.load %arg7[%c0_4, %c0_5] : memref<1x1xf32, #tpu.memory_space<vmem>>, vector<1x1xf32>
    %7 = vector.broadcast %6 : vector<1x1xf32> to vector<1x8xf32>
    %8 = arith.addf %5, %7 : vector<1x8xf32>
    %9 = arith.index_cast %arg0 : i32 to index
    %c0_6 = arith.constant 0 : index
    %c0_7 = arith.constant 0 : index
    %10 = vector.load %arg5[%9, %c0_6, %c0_7] : memref<1x1x8xf32, #tpu.memory_space<vmem>>, vector<1x1x8xf32>
    %11 = vector.shape_cast %10 : vector<1x1x8xf32> to vector<1x8xf32>
    %12 = vector.shape_cast %8 : vector<1x8xf32> to vector<1x1x8xf32>
    tpu.vector_store %arg5[%9, %c0_6, %c0_7], %12 {strides = array<i32>} : memref<1x1x8xf32, #tpu.memory_space<vmem>>, vector<1x1x8xf32>,
    %c0_i32_8 = arith.constant 0 : i32
    %13 = arith.cmpi eq, %arg0, %c0_i32_8 : i32
    %14 = arith.extui %13 : i1 to i32
    %c0_i32_9 = arith.constant 0 : i32
    %15 = arith.cmpi ne, %14, %c0_i32_9 : i32
    scf.if %15 {
      %c0_10 = arith.constant 0 : index
      %c0_11 = arith.constant 0 : index
      %c0_12 = arith.constant 0 : index
      %16 = vector.load %arg5[%c0_10, %c0_11, %c0_12] : memref<1x1x8xf32, #tpu.memory_space<vmem>>, vector<1x1x8xf32>
      %cst_13 = arith.constant dense<0xFF800000> : vector<1xf32>
      %17 = vector.multi_reduction <maximumf>, %16, %cst_13 [0, 2] : vector<1x1x8xf32> to vector<1xf32>
      %18 = vector.shape_cast %17 : vector<1xf32> to vector<1x1x1xf32>
      %19 = vector.broadcast %18 : vector<1x1x1xf32> to vector<1x1x8xf32>
      %20 = arith.subf %16, %19 : vector<1x1x8xf32>
      %21 = math.exp %20 : vector<1x1x8xf32>
      %cst_14 = arith.constant dense<0.000000e+00> : vector<1xf32>
      %22 = vector.multi_reduction <add>, %21, %cst_14 [0, 2] : vector<1x1x8xf32> to vector<1xf32>
      %23 = vector.shape_cast %22 : vector<1xf32> to vector<1x1x1xf32>
      %24 = tpu.reciprocal %23 : vector<1x1x1xf32> -> vector<1x1x1xf32>
      %25 = vector.broadcast %24 : vector<1x1x1xf32> to vector<1x1x8xf32>
      %26 = arith.mulf %21, %25 : vector<1x1x8xf32>
      %c0_15 = arith.constant 0 : index
      %c0_16 = arith.constant 0 : index
      %c0_17 = arith.constant 0 : index
      %27 = vector.load %arg5[%c0_15, %c0_16, %c0_17] : memref<1x1x8xf32, #tpu.memory_space<vmem>>, vector<1x1x8xf32>
      tpu.vector_store %arg5[%c0_15, %c0_16, %c0_17], %26 {strides = array<i32>} : memref<1x1x8xf32, #tpu.memory_space<vmem>>, vector<1x1x8xf32>,
    } else {
    }
    return
  }
  func.func @transform_0(%arg0: i32) -> (i32, i32) {
    %c0_i32 = arith.constant 0 : i32
    %c0_i32_0 = arith.constant 0 : i32
    %c0_i32_1 = arith.constant 0 : i32
    return %c0_i32, %c0_i32_0 : i32, i32
  }
  func.func @transform_1(%arg0: i32) -> (i32, i32) {
    %c0_i32 = arith.constant 0 : i32
    %c0_i32_0 = arith.constant 0 : i32
    %c0_i32_1 = arith.constant 0 : i32
    return %c0_i32, %c0_i32_0 : i32, i32
  }
  func.func @transform_2(%arg0: i32) -> (i32, i32) {
    %c0_i32 = arith.constant 0 : i32
    %c0_i32_0 = arith.constant 0 : i32
    %c0_i32_1 = arith.constant 0 : i32
    return %c0_i32, %c0_i32_0 : i32, i32
  }
  func.func @transform_3(%arg0: i32) -> (i32, i32) {
    %c0_i32 = arith.constant 0 : i32
    %c0_i32_0 = arith.constant 0 : i32
    return %arg0, %c0_i32 : i32, i32
  }
  func.func @transform_4(%arg0: i32) -> (i32, i32, i32) {
    %c0_i32 = arith.constant 0 : i32
    %c0_i32_0 = arith.constant 0 : i32
    %c0_i32_1 = arith.constant 0 : i32
    %c0_i32_2 = arith.constant 0 : i32
    return %c0_i32, %c0_i32_0, %c0_i32_1 : i32, i32, i32
  }
}

</mosaic_0001>

<bundles_post_ra>
// kernel: tpu_custom_call.1
= control target key start
LH: loop header
LB: loop body
LE: loop exit
PB: predicated region body
PF: predicated region fallthrough
CT: control target
= control target key end

     0   :  { %9 = vsyncpa [#allocation5], 0  ;;  %s466_s0 = inlined_call_operand.hbm [shape: f32[1,32], index: 0, kind: input, shape index: {}]   ;;  %s467_s1 = inlined_call_operand.hbm [shape: f32[32,64], index: 1, kind: input, shape index: {}]   ;;  %s468_s2 = inlined_call_operand.vmem [shape: f32[1,32], index: 2, kind: input, shape index: {}]   ;;  %s469_s3 = inlined_call_operand.vmem [shape: f32[8,64], index: 3, kind: input, shape index: {}]   ;;  %s470_s4 = inlined_call_operand.hbm [shape: f32[1,1,8], index: 4, kind: output, shape index: {}]  }
   0x1   :  { %10 = vsyncpa [#allocation8], 0 }
   0x2   :  { %11 = vsyncpa [#allocation6], 0  ;;  %s379_s15 = smov [#allocation4]   ;;  %s380_s17 = smov [#allocation7]  }
   0x3   :  { %s18_s16 = sshll.u32 %s379_s15, 4  ;;  %s27_s18 = sshll.u32 %s380_s17, 4  ;;  %s19_s16 = int_to_ptr.vmem [resolvable:$true] %s18_s16  ;;  %s413_s18 = int_to_ptr.vmem [resolvable:$true] %s27_s18 }
   0x4   :  { %s307_s21 = scalar_lea.hbm %s466_s0, 16 }
   0x5   :  { %p308_p0 = scmp.ne.s32.totalorder %s466_s0, %s307_s21  ;;  %p311_p1 = scmp.lt.u32.totalorder %s307_s21, %s466_s0 }
   0x7   :  { %p313_p2 = pnand %p311_p1, %p308_p0 }
   0x9   :  { %316 = shalt.err (!%p313_p2)
}
   0xa   :  { %s317_s26 = scalar_lea.vmem %s19_s16, 16  ;;  %s321_s27 = scalar_lea.vmem %s19_s16, 32 }
   0xb   :  { %p318_p3 = scmp.ne.s32.totalorder %s19_s16, %s317_s26  ;;  %p322_p4 = scmp.lt.s32.totalorder %s19_s16, %s19_s16 }
   0xc   :  { %p323_p5 = scmp.lt.s32.totalorder %s321_s27, %s317_s26 }
   0xe   :  { %p324_p6 = por %p323_p5, %p322_p4 }
  0x10   :  { %p325_p7 = pnand %p324_p6, %p318_p3 }
  0x12   :  { %328 = shalt.err (!%p325_p7)
}
  0x13   :  { %21 = dma.hbm_to_vmem [thread:$0]  %s466_s0, 16, %s19_s16, [#allocation5]  }
  0x14   :  { %s329_s6 = scalar_lea.hbm %s467_s1, 512 }
  0x15   :  { %p330_p8 = scmp.ne.s32.totalorder %s467_s1, %s329_s6  ;;  %p333_p9 = scmp.lt.u32.totalorder %s329_s6, %s467_s1 }
  0x17   :  { %p335_p10 = pnand %p333_p9, %p330_p8 }
  0x19   :  { %338 = shalt.err (!%p335_p10)
}
  0x1a   :  { %s339_s11 = scalar_lea.vmem %s413_s18, 512  ;;  %p344_p12 = scmp.lt.s32.totalorder %s413_s18, %s413_s18 }
  0x1b   :  { %p340_p11 = scmp.ne.s32.totalorder %s413_s18, %s339_s11  ;;  %p345_p13 = scmp.lt.s32.totalorder %s339_s11, %s339_s11 }
  0x1d   :  { %p346_p0 = por %p345_p13, %p344_p12 }
  0x1f   :  { %p347_p1 = pnand %p346_p0, %p340_p11 }
  0x21   :  { %350 = shalt.err (!%p347_p1)
}
  0x22   :  { %s381_s0 = smov 128   ;;  %s382_s12 = smov 8  }
  0x23   :  { %33 = dma.hbm_to_vmem [thread:$0]  %s467_s1, 512, %s413_s18, [#allocation8], %s381_s0, %s381_s0, %s382_s12  }
  0x24   :  { %373 = dma.done.wait [#allocation5], 16  }
  0x25   :  { %374 = vsyncadd [#allocation5], 4294967280 }
  0x26   :  { %375 = dma.done.wait [#allocation8], 512  }
  0x27   :  { %376 = vsyncadd [#allocation8], 4294966784  ;;  %v383_v0 = vmov 0.0|0.0   ;;  %vm384_vm0 = vmmov 0   ;;  %v385_v1 = vmov 0.0   ;;  %v49_v2 = vld [vmem:[#allocation7] sm:$0xff]  ;;  %v146_v20 = vlaneseq }
  0x28   :  { %287 = vmatprep.subr.bf16.mxu0 %v383_v0  ;;  %279 = vmatprep.mubr.msk.f32.mxu0 %vm384_vm0, %v385_v1  ;;  %v50_v3 = vld [vmem:[#allocation7 + $0x8] sm:$0xff]  ;;  %v51_v4 = vld [vmem:[#allocation7 + $0x10] sm:$0xff]  ;;  %v52_v6 = vld [vmem:[#allocation7 + $0x18] sm:$0xff]  ;;  %vm132_vm1 = vcmask 253952   ;;  %vm53_vm2 = vcmask 261120   ;;  %vm150_vm3 = vcmask 523264  }
  0x29   :  { %282 = vmatprep.subr.mxu1 %v385_v1  ;;  %284 = vmatprep.mubr.msk.f32.mxu1 %vm384_vm0, %v385_v1  ;;  %v288_v5 = vpack.c.bf16 %v50_v3, %v49_v2  ;;  %v129_v7 = vld [vmem:[#allocation4] sm:$0x1]  ;;  %v130_v8 = vld [vmem:[%s468_s2] sm:$0x1]  ;;  %v291_v9 = vpack.c.bf16 %v52_v6, %v51_v4  ;;  %v386_v14 = vmov 0   ;;  %vm136_vm4 = vcmask 0  }
  0x2a   :  { %v131_v10 = vmul.f32 %v130_v8, %v129_v7  ;;  %v48_v12 = vld [vmem:[#allocation4] sm:$0x1]  ;;  %v139_v13 = vld [vmem:[%s469_s3] sm:$0xff]  ;;  %302 = vset.pattern.permute.xlu0 %v386_v14  ;;  %vm127_vm5 = vcmask 516096   ;;  %v147_v21 = vshrl.u32 %v146_v20, 7  ;;  %vm227_vm6 = vcmask 57344  }
  0x2b   :  { %289 = vmatpush3.bf16.msra.mxu0 %v288_v5  ;;  %283 = vmatpush3.xpose.msk.msra.mxu1 %vm150_vm3, %v139_v13  ;;  %s387_s2 = smov [#allocation9]  }
  0x2c   :  { %290 = vmatprep.subr.bf16.mxu0 %v383_v0  ;;  %v133_v11 = vsel %vm132_vm1, %v131_v10, 0.0  ;;  %v148_v22 = vsub.s32 0, %v147_v21  ;;  %s251_s3 = sshll.u32 %s387_s2, 4  ;;  %s252_s3 = int_to_ptr.vmem [resolvable:$true] %s251_s3 }
  0x2d   :  { %134 = vadd.xlane.f32.xlu0 %v133_v11  ;;  %s351_s18 = scalar_lea.vmem %s252_s3, 16  ;;  %s355_s19 = scalar_lea.vmem %s252_s3, 32 }
  0x2e   :  { %p352_p2 = scmp.ne.s32.totalorder %s252_s3, %s351_s18  ;;  %p356_p3 = scmp.lt.s32.totalorder %s252_s3, %s252_s3 }
  0x2f   :  { %292 = vmatpush3.bf16.msra.mxu0 %v291_v9  ;;  %p357_p4 = scmp.lt.s32.totalorder %s355_s19, %s351_s18 }
  0x31   :  { %p358_p5 = por %p357_p4, %p356_p3 }
  0x32   :  { %280 = vmatmul.mubr.msk.f32.vlgmr.msra.gmra.mrb[0].mxu0 %vm53_vm2, %v48_v12 }
  0x33   :  { %p359_p6 = pnand %p358_p5, %p352_p2 }
  0xba   :  { %v135_v15 = vpop.xlane.xlu0 %134 }
  0xbb   :  { %137 = vst.msk [vmem:[#allocation3] sm:$0x1] %vm136_vm4, %v135_v15 }
  0xc2   :  { %v140_v16 = vld [vmem:[#allocation3] sm:$0x1] }
  0xc3   :  { %143 = vperm.xlu0 %302, %v140_v16  }
 0x105   :  { %v123_v17 = vpop.f32.mrb[0].mxu0 }
 0x106   :  { %128 = vst.msk [vmem:[#allocation2] sm:$0x1] %vm127_vm5, %v123_v17  ;;  %v281_v18 = vpop.f32.mrb[1].mxu0 }
 0x10d   :  { %v138_v19 = vld [vmem:[#allocation2] sm:$0x1] }
 0x10e   :  { %285 = vmatmul.mubr.msk.f32.vlgmr.msra.gmra.mrb[0].mxu1 %vm150_vm3, %v138_v19 }
 0x142   :  { %v144_v23 = vpop.permute.xlu0 %143 }
 0x143   :  { %v149_v24 = vrot.slane %v144_v23, %v148_v22 }
 0x1e1   :  { %v223_v25 = vpop.f32.mrb[0].mxu1 }
 0x1e2   :  { %v224_v26 = vadd.f32 %v223_v25, %v149_v24  ;;  %v286_v27 = vpop.f32.mrb[1].mxu1 }
 0x1e4   :  { %228 = vst.msk [vmem:[#allocation9] sm:$0x1] %vm227_vm6, %v224_v26 }
 0x1eb   :  { %v232_v28 = vld [vmem:[#allocation9] sm:$0x1] }
 0x1ec   :  { %v233_v29 = vsel %vm227_vm6, %v232_v28, -inf }
 0x1ed   :  { %234 = vmax.xlane.f32.xlu1 %v233_v29 }
 0x27a   :  { %v235_v30 = vpop.xlane.xlu1 %234 }
 0x27b   :  { %v236_v31 = vsub.f32 %v232_v28, %v235_v30 }
 0x27d   :  { %v237_v32 = vmul.f32 1.442695, %v236_v31 }
 0x27f   :  { %303 = vpow2.f32 %v237_v32 }
 0x289   :  { %v304_v33 = vpop.eup %303 }
 0x28a   :  { %v239_v34 = vsel %vm227_vm6, %v304_v33, 0.0 }
 0x28b   :  { %240 = vadd.xlane.f32.xlu1 %v239_v34 }
 0x318   :  { %v241_v35 = vpop.xlane.xlu1 %240 }
 0x319   :  { %305 = vrcp.f32 %v241_v35 }
 0x323   :  { %v306_v36 = vpop.eup %305 }
 0x324   :  { %v243_v37 = vmul.f32 %v306_v36, %v304_v33 }
 0x326   :  { %244 = vst.msk [vmem:[#allocation9] sm:$0x1] %vm227_vm6, %v243_v37 }
 0x327   :  { %362 = shalt.err (!%p359_p6)
}
 0x328   :  { %s363_s22 = scalar_lea.hbm %s470_s4, 16 }
 0x329   :  { %p364_p7 = scmp.ne.s32.totalorder %s470_s4, %s363_s22  ;;  %p367_p8 = scmp.lt.u32.totalorder %s363_s22, %s470_s4 }
 0x32b   :  { %p369_p9 = pnand %p367_p8, %p364_p7 }
 0x32d   :  { %372 = shalt.err (!%p369_p9)
}
 0x32e   :  { %254 = dma.vmem_to_hbm [thread:$0]  %s252_s3, 16, %s470_s4, [#allocation6]  }
 0x32f   :  { %377 = dma.done.wait [#allocation6], 16  }
 0x330   :  { %378 = vsyncadd [#allocation6], 4294967280 }
 0x331   :  { %258 = vsyncpa [#allocation5], 1 }
 0x332   :  { %259 = vsyncpa [#allocation8], 1 }
 0x333   :  { %260 = vsyncpa [#allocation6], 1 }

</bundles_post_ra>
